<compile_context>
chip_gen: v6e
topology: v6e:2x2x1
jax: 0.10.0
libtpu: 0.0.40
codegen_flags: <defaults>
</compile_context>

<pallas_src>
import math
import functools

import jax
import jax.numpy as jnp
from jax.experimental import pallas as pl
from jax.experimental.pallas import tpu as pltpu


def _qkv_attention_kernel(qkv_ref, out_ref, *, ch, valid_len, kv_chunk, mm_dtype):
    """One grid step: [Gb, 3*ch, T] qkv groups -> [Gb, ch, T] attention output."""
    gb, _, t_pad = qkv_ref.shape
    num_chunks = t_pad // kv_chunk

    # Reference scales BOTH q and k by 1/ch**0.25; fold into one 1/sqrt(ch) on q
    # (safe: logits accumulate in f32 via preferred_element_type).
    scale = 1.0 / math.sqrt(ch)

    # Single minor-dim transpose per block: token-major q.  k/v stay channel
    # major so both matmuls below are in natively supported MXU forms.
    # NOTE: if ch % 8 != 0 the sublane slices are still correct but relayout.
    qt = (jnp.swapaxes(qkv_ref[:, 0:ch, :], 1, 2).astype(jnp.float32)
          * scale).astype(mm_dtype)                                  # [Gb, T, ch]

    def logits_for(s0):
        k = qkv_ref[:, ch:2 * ch, pl.ds(s0, kv_chunk)].astype(mm_dtype)      # [Gb, ch, Sc]
        v = qkv_ref[:, 2 * ch:3 * ch, pl.ds(s0, kv_chunk)].astype(mm_dtype)  # [Gb, ch, Sc]
        # [m=t, k=c] x [k=c, n=s] batched matmul, f32 accumulate.
        logits = jnp.einsum("gtc,gcs->gts", qt, k,
                            preferred_element_type=jnp.float32)              # [Gb, T, Sc] f32
        if valid_len < t_pad:  # static: only when the wrapper padded T
            col = jax.lax.broadcasted_iota(jnp.int32, logits.shape, 2) + s0
            logits = jnp.where(col < valid_len, logits, jnp.float32(-1e30))
        return logits, v

    if num_chunks == 1:
        # Plain f32 softmax path (typical small / mid T).
        logits, v = logits_for(0)
        m = jnp.max(logits, axis=-1, keepdims=True)
        e = jnp.exp(logits - m)
        p = (e * pl.reciprocal(jnp.sum(e, axis=-1, keepdims=True),
                               approx=True)).astype(mm_dtype)
        # Contract-last on both operands; result is directly channel-major, so
        # the store over T is lane-dense with no final transpose.
        acc = jnp.einsum("gcs,gts->gct", v, p,
                         preferred_element_type=jnp.float32)                 # [Gb, ch, T]
        out_ref[...] = acc.astype(out_ref.dtype)
    else:
        # Flash-style online softmax over key chunks: the f32 intermediates are
        # [Gb, T, kv_chunk] instead of [Gb, T, T].
        def body(i, carry):
            m_prev, l_prev, acc_prev = carry
            s0 = pl.multiple_of(i * kv_chunk, kv_chunk)
            logits, v = logits_for(s0)
            m_new = jnp.maximum(m_prev, jnp.max(logits, axis=-1, keepdims=True))
            alpha = jnp.exp(m_prev - m_new)                                  # [Gb, T, 1]
            p = jnp.exp(logits - m_new)                                      # [Gb, T, Sc]
            l_new = alpha * l_prev + jnp.sum(p, axis=-1, keepdims=True)
            pv = jnp.einsum("gts,gcs->gtc", p.astype(mm_dtype), v,
                            preferred_element_type=jnp.float32)              # [Gb, T, ch]
            return m_new, l_new, alpha * acc_prev + pv

        m0 = jnp.full((gb, t_pad, 1), -1e30, jnp.float32)
        l0 = jnp.zeros((gb, t_pad, 1), jnp.float32)
        a0 = jnp.zeros((gb, t_pad, ch), jnp.float32)
        _, l_f, acc = jax.lax.fori_loop(0, num_chunks, body, (m0, l0, a0))
        acc = acc * pl.reciprocal(l_f, approx=True)
        # One minor-dim transpose per block for the channel-major store.
        out_ref[...] = jnp.swapaxes(acc, 1, 2).astype(out_ref.dtype)


def _vmem_budget():
    """(physical VMEM bytes, explicit vmem_limit_bytes to request)."""
    try:
        cap = int(pltpu.get_tpu_info().vmem_capacity_bytes)
    except Exception:
        cap = 64 << 20  # conservative: v7x per-TensorCore VMEM
    limit = min(int(cap * 0.70), 100 << 20)
    return cap, limit


def _choose_kv_chunk(t_pad, vmem_budget):
    """Key-axis chunk for the flash-style loop; t_pad stays a single chunk when
    short or not 128-aligned."""
    if t_pad <= 512 or t_pad % 128 != 0:
        return t_pad
    best = 128
    for c in (256, 512):
        if t_pad % c == 0 and 20 * t_pad * c <= vmem_budget // 2:
            best = c
    return best


def _choose_group_block(num_groups, ch, t_pad, kv_chunk,
                        in_itemsize, mm_itemsize, vmem_budget):
    """Largest divisor of num_groups whose per-step working set fits the budget,
    preferring >=4 grid steps and an even step count (2 TensorCores on v7x)."""
    def step_bytes(gb):
        io = gb * (3 * ch + ch) * t_pad * in_itemsize * 2        # 2x-buffered in/out blocks
        qkt = gb * t_pad * ch * (4 + mm_itemsize)                # scaled q + token-major cast
        kv = 2 * gb * ch * kv_chunk * mm_itemsize                # k, v chunk casts
        soft = gb * t_pad * kv_chunk * (4 * 4 + mm_itemsize)     # ~4 f32 logits-sized temps + cast
        acc = gb * ch * t_pad * 4                                # f32 accumulator
        return io + qkt + kv + soft + acc

    divisors = [d for d in range(1, num_groups + 1) if num_groups % d == 0]
    fitting = [d for d in divisors if step_bytes(d) <= vmem_budget] or [1]
    pref = [d for d in fitting if num_groups // d >= 4] or fitting
    even = [d for d in pref if (num_groups // d) % 2 == 0] or pref
    return max(even)


def qkv_attention_legacy(qkv, n_heads, *, group_block=None, matmul_dtype=None):
    """Pallas TPU forward of QKVAttentionLegacy.

    qkv: [N, n_heads * 3 * ch, T]  ->  [N, n_heads * ch, T]
    """
    n, width, seq_len = qkv.shape
    assert width % (3 * n_heads) == 0
    ch = width // (3 * n_heads)
    num_groups = n * n_heads

    if matmul_dtype is None:
        # bf16 MXU operands + f32 accumulation/softmax (full MXU rate, f32 math
        # where it matters).  Pass matmul_dtype=jnp.float32 for bit-closeness.
        matmul_dtype = (jnp.bfloat16
                        if qkv.dtype in (jnp.float32, jnp.bfloat16)
                        else qkv.dtype)

    # Free contiguous reshape (legacy layout is [N, H, 3, ch, T] flattened).
    x = qkv.reshape(num_groups, 3 * ch, seq_len)

    # Small-T path: pad T up to 128 so stores are lane-dense and the MXU sees a
    # full tile; padded key columns are masked in-kernel.  (T >= 128 is left
    # unpadded: full-dim blocks satisfy the lane constraint.)
    t_pad = 128 if seq_len < 128 else seq_len
    if t_pad != seq_len:
        x = jnp.pad(x, ((0, 0), (0, 0), (0, t_pad - seq_len)))

    vmem_cap, vmem_limit = _vmem_budget()
    vmem_budget = int(vmem_limit * 0.8)

    kv_chunk = _choose_kv_chunk(t_pad, vmem_budget)
    assert t_pad % kv_chunk == 0

    if group_block is None:
        group_block = _choose_group_block(
            num_groups, ch, t_pad, kv_chunk,
            qkv.dtype.itemsize, jnp.dtype(matmul_dtype).itemsize, vmem_budget)
    assert num_groups % group_block == 0
    grid = (num_groups // group_block,)

    cost = pl.CostEstimate(
        flops=4 * num_groups * seq_len * seq_len * ch,
        transcendentals=num_groups * seq_len * seq_len,
        bytes_accessed=(qkv.size + num_groups * ch * seq_len) * qkv.dtype.itemsize)

    out = pl.pallas_call(
        functools.partial(_qkv_attention_kernel, ch=ch, valid_len=seq_len,
                          kv_chunk=kv_chunk, mm_dtype=matmul_dtype),
        out_shape=jax.ShapeDtypeStruct((num_groups, ch, t_pad), qkv.dtype),
        grid_spec=pltpu.PrefetchScalarGridSpec(
            num_scalar_prefetch=0,
            grid=grid,
            in_specs=[pl.BlockSpec((group_block, 3 * ch, t_pad),
                                   lambda i: (i, 0, 0))],
            out_specs=pl.BlockSpec((group_block, ch, t_pad),
                                   lambda i: (i, 0, 0)),
        ),
        compiler_params=pltpu.CompilerParams(
            dimension_semantics=("parallel",),
            vmem_limit_bytes=int(vmem_limit)),
        cost_estimate=cost,
    )(x)

    out = out.reshape(n, n_heads * ch, t_pad)
    if t_pad != seq_len:
        out = out[:, :, :seq_len]
    return out


def reference_qkv_attention_legacy(qkv, n_heads):
    """Pure-JAX mirror of the PyTorch QKVAttentionLegacy.forward."""
    bs, width, length = qkv.shape
    ch = width // (3 * n_heads)
    q, k, v = jnp.split(qkv.reshape(bs * n_heads, ch * 3, length), 3, axis=1)
    scale = 1.0 / math.sqrt(math.sqrt(ch))
    w = jnp.einsum("bct,bcs->bts", q * scale, k * scale,
                   precision=jax.lax.Precision.HIGHEST)
    w = jax.nn.softmax(w.astype(jnp.float32), axis=-1).astype(w.dtype)
    a = jnp.einsum("bts,bcs->bct", w, v,
                   precision=jax.lax.Precision.HIGHEST)
    return a.reshape(bs, -1, length)


if __name__ == "__main__":
    # Shapes consistent with the module: N=2, n_heads=4, ch=8, T=16
    # => qkv is [N, n_heads*3*ch, T] = [2, 96, 16].
    N, n_heads, ch, T = 2, 4, 8, 16
    key = jax.random.PRNGKey(0)
    qkv = jax.random.normal(key, (N, 3 * n_heads * ch, T), dtype=jnp.float32)

    ref = reference_qkv_attention_legacy(qkv, n_heads)

    # Default performance path: bf16 matmul operands, f32 softmax/accumulation.
    out = jax.block_until_ready(qkv_attention_legacy(qkv, n_heads))
    assert out.shape == (N, n_heads * ch, T), out.shape
    assert jnp.allclose(out, ref, rtol=5e-2, atol=5e-2), (
        f"bf16 path max abs err {jnp.max(jnp.abs(out - ref))}")

    # Full-f32 matmul path: tight agreement with the HIGHEST-precision reference.
    out32 = jax.block_until_ready(
        qkv_attention_legacy(qkv, n_heads, matmul_dtype=jnp.float32))
    assert jnp.allclose(out32, ref, rtol=1e-3, atol=1e-3), (
        f"f32 path max abs err {jnp.max(jnp.abs(out32 - ref))}")

    # Long-sequence check (T=640 > 512): exercises the flash-style key-chunk loop.
    qkv2 = jax.random.normal(jax.random.PRNGKey(1), (1, 3 * 2 * 8, 640),
                             dtype=jnp.float32)
    ref2 = reference_qkv_attention_legacy(qkv2, 2)
    out2 = jax.block_until_ready(
        qkv_attention_legacy(qkv2, 2, matmul_dtype=jnp.float32))
    assert jnp.allclose(out2, ref2, rtol=1e-3, atol=1e-3), (
        f"flash path max abs err {jnp.max(jnp.abs(out2 - ref2))}")

    print("KERNEL_OK")
</pallas_src>

<mosaic_0001>
module attributes {stable_mosaic.version = 11 : i64} {
  func.func @_qkv_attention_kernel(%arg0: i32, %arg1: memref<2x24x128xf32, #tpu.memory_space<vmem>>, %arg2: memref<2x8x128xf32, #tpu.memory_space<vmem>>) attributes {dimension_semantics = [#tpu.dimension_semantics<parallel>], iteration_bounds = array<i64: 4>, scalar_prefetch = 0 : i64, scratch_operands = 0 : i64, tpu.core_type = #tpu.core_type<tc>, window_params = [{transform_indices = @transform_0, window_bounds = array<i64: 2, 24, 128>}, {transform_indices = @transform_1, window_bounds = array<i64: 2, 8, 128>}]} {
    %c0 = arith.constant 0 : index
    %c0_0 = arith.constant 0 : index
    %c0_1 = arith.constant 0 : index
    %0 = vector.load %arg1[%c0, %c0_0, %c0_1] : memref<2x24x128xf32, #tpu.memory_space<vmem>>, vector<2x8x128xf32>
    %1 = tpu.transpose %0, [0, 2, 1] : vector<2x8x128xf32> -> vector<2x128x8xf32>
    %cst = arith.constant 0.353553385 : f32
    %2 = vector.broadcast %cst : f32 to vector<2x128x8xf32>
    %3 = arith.mulf %1, %2 : vector<2x128x8xf32>
    %4 = arith.truncf %3 : vector<2x128x8xf32> to vector<2x128x8xbf16>
    %c0_2 = arith.constant 0 : index
    %c8 = arith.constant 8 : index
    %c0_3 = arith.constant 0 : index
    %5 = vector.load %arg1[%c0_2, %c8, %c0_3] : memref<2x24x128xf32, #tpu.memory_space<vmem>>, vector<2x8x128xf32>
    %6 = arith.truncf %5 : vector<2x8x128xf32> to vector<2x8x128xbf16>
    %c0_4 = arith.constant 0 : index
    %c16 = arith.constant 16 : index
    %c0_5 = arith.constant 0 : index
    %7 = vector.load %arg1[%c0_4, %c16, %c0_5] : memref<2x24x128xf32, #tpu.memory_space<vmem>>, vector<2x8x128xf32>
    %8 = arith.truncf %7 : vector<2x8x128xf32> to vector<2x8x128xbf16>
    "tpu.trace_start"() <{level = 10 : i32, message = "gtc,gcs->gts"}> : () -> ()
    %cst_6 = arith.constant dense<0.000000e+00> : vector<2x128x128xf32>
    %9 = tpu.matmul %4, %6, %cst_6 {dimension_numbers = #tpu.dot_dimension_numbers<[2], [1], [1], [2], [0, 0, 0, 1, 1, 2], [0], [0]>} : vector<2x128x8xbf16>, vector<2x8x128xbf16>, vector<2x128x128xf32> -> vector<2x128x128xf32>
    "tpu.trace_stop"() : () -> ()
    %10 = tpu.iota {dimensions = array<i32: 2>} : vector<2x128x128xi32>
    %c0_i32 = arith.constant 0 : i32
    %11 = vector.broadcast %c0_i32 : i32 to vector<2x128x128xi32>
    %12 = arith.addi %10, %11 : vector<2x128x128xi32>
    %c16_i32 = arith.constant 16 : i32
    %13 = vector.broadcast %c16_i32 : i32 to vector<2x128x128xi32>
    %14 = arith.cmpi slt, %12, %13 : vector<2x128x128xi32>
    %cst_7 = arith.constant -1.000000e+30 : f32
    %15 = vector.broadcast %cst_7 : f32 to vector<2x128x128xf32>
    %16 = arith.select %14, %9, %15 : vector<2x128x128xi1>, vector<2x128x128xf32>
    %cst_8 = arith.constant dense<0xFF800000> : vector<2x128xf32>
    %17 = vector.multi_reduction <maximumf>, %16, %cst_8 [2] : vector<2x128x128xf32> to vector<2x128xf32>
    %18 = vector.shape_cast %17 : vector<2x128xf32> to vector<2x128x1xf32>
    %19 = vector.broadcast %18 : vector<2x128x1xf32> to vector<2x128x128xf32>
    %20 = arith.subf %16, %19 : vector<2x128x128xf32>
    %21 = math.exp %20 : vector<2x128x128xf32>
    %cst_9 = arith.constant dense<0.000000e+00> : vector<2x128xf32>
    %22 = vector.multi_reduction <add>, %21, %cst_9 [2] : vector<2x128x128xf32> to vector<2x128xf32>
    %23 = vector.shape_cast %22 : vector<2x128xf32> to vector<2x128x1xf32>
    %24 = tpu.reciprocal %23 {approx = true} : vector<2x128x1xf32> -> vector<2x128x1xf32>
    %25 = vector.broadcast %24 : vector<2x128x1xf32> to vector<2x128x128xf32>
    %26 = arith.mulf %21, %25 : vector<2x128x128xf32>
    %27 = arith.truncf %26 : vector<2x128x128xf32> to vector<2x128x128xbf16>
    "tpu.trace_start"() <{level = 10 : i32, message = "gcs,gts->gct"}> : () -> ()
    %cst_10 = arith.constant dense<0.000000e+00> : vector<2x8x128xf32>
    %28 = tpu.matmul %8, %27, %cst_10 {dimension_numbers = #tpu.dot_dimension_numbers<[2], [2], [1], [1], [0, 0, 0, 1, 1, 1], [0], [0]>} : vector<2x8x128xbf16>, vector<2x128x128xbf16>, vector<2x8x128xf32> -> vector<2x8x128xf32>
    "tpu.trace_stop"() : () -> ()
    %c0_11 = arith.constant 0 : index
    %c0_12 = arith.constant 0 : index
    %c0_13 = arith.constant 0 : index
    %29 = vector.load %arg2[%c0_11, %c0_12, %c0_13] : memref<2x8x128xf32, #tpu.memory_space<vmem>>, vector<2x8x128xf32>
    tpu.vector_store %arg2[%c0_11, %c0_12, %c0_13], %28 {strides = array<i32>} : memref<2x8x128xf32, #tpu.memory_space<vmem>>, vector<2x8x128xf32>,
    return
  }
  func.func @transform_0(%arg0: i32) -> (i32, i32, i32) {
    %c0_i32 = arith.constant 0 : i32
    %c0_i32_0 = arith.constant 0 : i32
    %c0_i32_1 = arith.constant 0 : i32
    return %arg0, %c0_i32, %c0_i32_0 : i32, i32, i32
  }
  func.func @transform_1(%arg0: i32) -> (i32, i32, i32) {
    %c0_i32 = arith.constant 0 : i32
    %c0_i32_0 = arith.constant 0 : i32
    %c0_i32_1 = arith.constant 0 : i32
    return %arg0, %c0_i32, %c0_i32_0 : i32, i32, i32
  }
}

</mosaic_0001>

<bundles_post_ra>
// kernel: tpu_custom_call.1
= control target key start
LH: loop header
LB: loop body
LE: loop exit
PB: predicated region body
PF: predicated region fallthrough
CT: control target
= control target key end

     0   :  { %6 = vsyncpa [#allocation3], 0  ;;  %s2012_s0 = inlined_call_operand.hbm [shape: f32[8,24,128], index: 0, kind: input, shape index: {}]   ;;  %s2013_s1 = inlined_call_operand.hbm [shape: f32[8,8,128], index: 1, kind: output, shape index: {}]  }
   0x1   :  { %8 = vsyncpa [#allocation3 + $0x1], 0 }
   0x2   :  { %9 = vsyncpa [#allocation4], 0 }
   0x3   :  { %11 = vsyncpa [#allocation4 + $0x1], 0  ;;  %s1458_s6 = smov 0   ;;  %s1460_s7 = smov 0  }
   0x4   :  { %s1462_s8 = smov 0   ;;  %s1464_s9 = smov 0  }
   0x5 LB: > { %s1479_s10 = sadd.s32 4294967295, %s1438_s9   ;;  %s1019_s11 = sadd.s32 4294967294, %s1438_s9   ;;  %s1438_s9 = sphi %s1464_s9, %s2026_s9   ;;  %s1434_s8 = sphi %s1462_s8, %s2025_s8   ;;  %s1430_s7 = sphi %s1460_s7, %s2024_s7   ;;  %s1426_s6 = sphi %s1458_s6, %s2023_s6  }
   0x6   : > { %s1483_s12 = sadd.s32 1, %s1438_s9   ;;  %s24_s13 = sadd.s32 1, %s1434_s8 }
   0x7   : > { %s21_s14 = ssub.s32 %s1438_s9, %s1483_s12  ;;  %p31_p0 = scmp.ne.s32.totalorder %s1434_s8, %s1430_s7 }
   0x8   : > { %p22_p1 = scmp.eq.s32.totalorder %s21_s14, 0  ;;  %p32_p2 = scmp.eq.s32.totalorder %s1438_s9, 0 }
   0x9   : > { %p37_p3 = scmp.ne.s32.totalorder %s1430_s7, %s1426_s6  ;;  %p38_p4 = scmp.eq.s32.totalorder %s1479_s10, 0 }
   0xa   : > { %s1495_s15 = scalar_select %p22_p1, %s1434_s8, %s24_s13  }
   0xb   : > { %p33_p5 = por %p32_p2, %p31_p0  ;;  %p1497_p6 = por %p38_p4, %p37_p3 }
   0xc   : > { %p61_p7 = scmp.eq.s32.totalorder %s1479_s10, 3  ;;  %p67_p8 = scmp.eq.s32.totalorder %s1019_s11, 3 }
   0xd   : > { %s2016_s16 = scalar_select %p1497_p6, 1, 0 }
   0xe   : > { %p1178_p9 = scmp.lt.s32.totalorder %s1438_s9, 4  ;;  %p1503_p10 = por %p61_p7, %p31_p0 }
   0xf   : > { %p1507_p11 = por %p67_p8, %p37_p3  ;;  %s87_s19 = sand.u32 1, %s1434_s8  }
  0x10   : > { %s2017_s17 = scalar_select %p1503_p10, 1, 0 }
  0x11   : > { %s2018_s18 = scalar_select %p1507_p11, 1, 0 }
  0x12   : > { %s1164_s20 = smul.u32 768, %s1438_s9  ;;  %p1518_p12 = pnand %p1178_p9, %p33_p5 }
  0x13   : > { %s1163_s21 = smul.u32 48, %s87_s19  ;;  %s1524_s28 = scalar_lea.sflag [#allocation3], %s87_s19 }
  0x14   : > { %s1516_s24 = scalar_lea.hbm %s2012_s0, %s1164_s20  ;;  %p1348_p0 = pneg %p1518_p12 }
  0x15   : > { %s91_s26 = scalar_lea.vmem [#allocation2], %s1163_s21  ;;  %s1346_s29 = scalar_lea.hbm %s1516_s24, 768 }
  0x16   : > { %s99_s27 = sshll.u32 %s91_s26, 4  ;;  %p1347_p13 = scmp.ne.s32.totalorder %s1516_s24, %s1346_s29  ;;  %s1522_s27 = int_to_ptr.vmem [resolvable:$true] %s99_s27 }
  0x17   : > { %s1351_s3 = scalar_lea.hbm %s2012_s0, 3072  ;;  %p1352_p3 = scmp.lt.s32.totalorder %s1516_s24, %s2012_s0 }
  0x18   : > { %p1349_p1 = pnand %p1348_p0, %p1347_p13  ;;  %p1353_p4 = scmp.lt.s32.totalorder %s1351_s3, %s1346_s29 }
  0x1a   : > { %p1350_p2 = pneg %p1349_p1  ;;  %p1354_p5 = por %p1353_p4, %p1352_p3 }
  0x1c   : > { %p1355_p7 = pnand %p1354_p5, %p1350_p2 }
  0x1e   : > { %1358 = shalt.err (!%p1355_p7)
}
  0x1f   : > { %s1359_s11 = scalar_lea.vmem %s1522_s27, 768  ;;  %s1440_s13 = smov [#allocation2]  }
  0x20   : > { %p1360_p8 = scmp.ne.s32.totalorder %s1522_s27, %s1359_s11  ;;  %s1364_s14 = sshll.u32 %s1440_s13, 4  ;;  %s1365_s14 = int_to_ptr.vmem [resolvable:$false] %s1364_s14 }
  0x21   : > { %s1366_s19 = scalar_lea.vmem %s1365_s14, 1536  ;;  %p1367_p1 = scmp.lt.s32.totalorder %s1522_s27, %s1365_s14 }
  0x22   : > { %p1362_p9 = pnand %p1360_p8, %p1348_p0  ;;  %p1368_p11 = scmp.lt.s32.totalorder %s1366_s19, %s1359_s11 }
  0x24   : > { %p1363_p13 = pneg %p1362_p9  ;;  %p1369_p10 = por %p1368_p11, %p1367_p1 }
  0x26   : > { %p1370_p6 = pnand %p1369_p10, %p1363_p13 }
  0x28   : > { %1373 = shalt.err (!%p1370_p6)
}
  0x29   : > { %s1441_s20 = smov 128   ;;  %s1442_s21 = smov 8  }
  0x2a   : > { %1173 = dma.hbm_to_vmem [thread:$0]  (!%p1518_p12), %s1516_s24, 768, %s1522_s27, %s1524_s28, %s1441_s20, %s1441_s20, %s1442_s21  }
  0x2b   : > { %p1025_p0 = scmp.ge.s32.totalorder %s1438_s9, 1  ;;  %p107_p2 = scmp.lt.s32.totalorder %s1438_s9, 5 }
  0x2d   : > { %p108_p3 = pnand %p1025_p0, %p107_p2 }
  0x2e   : > { %s1548_s22 = sand.u32 (!%p108_p3), 1, %s1430_s7   ;;  %p2020_p6 = scmp.ne.s32.totalorder (!%p108_p3), %s2016_s16, 0 }
  0x2f   : > { %111 = sbr.rel (%p108_p3) target bundleno = 1117 (0x45d), region = 24  ;;  %s114_s26 = scalar_lea.sflag (!%p108_p3), [#allocation3], %s1548_s22 }
  0x30   : > { %s1165_s23 = smul.u32 (!%p108_p3), 48, %s1548_s22 }
  0x32   : > { %s1552_s29 = scalar_lea.vmem (!%p108_p3), [#allocation2], %s1165_s23 }
  0x34   : > { %1417 = dma.done.wait (%p2020_p6), %s114_s26, 768  }
  0x35   : > { %1419 = vsyncadd (%p2020_p6), %s114_s26, 4294966528  ;;  %v139_v0 = vld [vmem:[%s1552_s29] sm:$0xff]  ;;  %v253_v1 = vld [vmem:[%s1552_s29 + $0x8] sm:$0xff]  ;;  %vm286_vm0 = vcmask 1043456   ;;  %vm261_vm1 = vcmask 64512   ;;  %vm1444_vm3 = vmmov 0  }
  0x36   : > { %141 = vxpose.xlu0.b32.start.end [1/1] (short) %v139_v0, 128  ;;  %v255_v2 = vpack.c.bf16 %v253_v1, %v253_v1  ;;  %v140_v4 = vld [vmem:[%s1552_s29 + $0x18] sm:$0xff]  ;;  %v254_v5 = vld [vmem:[%s1552_s29 + $0x20] sm:$0xff]  ;;  %s1026_s16 = sshll.u32 %s1548_s22, 4  ;;  %s1048_s27 = sshll.u32 %s1479_s10, 8 }
  0x37   : > { %v256_v6 = vpack.c.bf16 %v254_v5, %v254_v5  ;;  %s135_s24 = scalar_lea.vmem [#allocation5], %s1026_s16  ;;  %s1970_s2 = scalar_lea.hbm %s2013_s1, %s1048_s27 }
  0x38   : > { %1161 = vmatprep.subr.msk.bf16.mxu0 %vm286_vm0, %v255_v2  ;;  %v288_v3 = vsel %vm286_vm0, %v255_v2, 0  ;;  %s946_s25 = sshll.u32 %s135_s24, 4  ;;  %s933_s3 = scalar_lea.sflag [#allocation4], %s1548_s22  ;;  %s1965_s25 = int_to_ptr.vmem [resolvable:$true] %s946_s25 }
  0x39   : > { %1086 = vmatpush3.bf16.msra.mxu0 %v288_v3  ;;  %1162 = vmatprep.subr.msk.bf16.mxu1 %vm286_vm0, %v256_v6  ;;  %v412_v7 = vsel %vm286_vm0, %v256_v6, 0  ;;  %s1374_s10 = scalar_lea.vmem %s1965_s25, 256  ;;  %p2021_p11 = scmp.ne.s32.totalorder %s2017_s17, 0 }
  0x3a   : > { %1104 = vmatpush3.bf16.msra.mxu1 %v412_v7  ;;  %p1375_p10 = scmp.ne.s32.totalorder %s1965_s25, %s1374_s10  ;;  %s1445_s4 = smov [#allocation5]  }
  0x3b   : > { %s1378_s5 = sshll.u32 %s1445_s4, 4  ;;  %s1379_s5 = int_to_ptr.vmem [resolvable:$false] %s1378_s5 }
  0x3c   : > { %p1376_p12 = pnand %p1375_p10, %p2021_p11  ;;  %s1380_s11 = scalar_lea.vmem %s1379_s5, 512 }
  0x3d   : > { %p1381_p5 = scmp.lt.s32.totalorder %s1965_s25, %s1379_s5  ;;  %p1382_p7 = scmp.lt.s32.totalorder %s1380_s11, %s1374_s10 }
  0x3e   : > { %p1377_p4 = pneg %p1376_p12 }
  0x3f   : > { %p1383_p8 = por %p1382_p7, %p1381_p5 }
  0x41   : > { %p1384_p9 = pnand %p1383_p8, %p1377_p4 }
  0x73   : > { %173 = vxpose.xlu0.b32.start.end [1/1] (short) %v140_v4, 128 }
  0xb2   : > { %v157_v8 = vpop.trf.xlu0 }
  0xb3   : > { %v205_v10 = vmul.f32 0.35355338, %v157_v8 }
  0xb6   : > { %v158_v9 = vpop.trf.xlu0 }
  0xb7   : > { %v206_v11 = vmul.f32 0.35355338, %v158_v9 }
  0xb9   : > { %v237_v12 = vpack.c.bf16 %v206_v11, %v205_v10 }
  0xba   : > { %v159_v13 = vpop.trf.xlu0 }
  0xbb   : > { %1087 = vmatprep.mubr.msk.bf16.mxu0 %vm261_vm1, %v237_v12  ;;  %v207_v15 = vmul.f32 0.35355338, %v159_v13 }
  0xbe   : > { %v160_v14 = vpop.trf.xlu0 }
  0xbf   : > { %v208_v16 = vmul.f32 0.35355338, %v160_v14 }
  0xc1   : > { %v238_v17 = vpack.c.bf16 %v208_v16, %v207_v15 }
  0xc2   : > { %v161_v18 = vpop.trf.xlu0 }
  0xc3   : > { %1088 = vmatmul.mubr.msk.bf16.vlgmr.msra.gmra.mxu0 %vm261_vm1, %v238_v17  ;;  %v209_v20 = vmul.f32 0.35355338, %v161_v18 }
  0xc6   : > { %v162_v19 = vpop.trf.xlu0 }
  0xc7   : > { %v210_v21 = vmul.f32 0.35355338, %v162_v19 }
  0xc9   : > { %v239_v22 = vpack.c.bf16 %v210_v21, %v209_v20 }
  0xca   : > { %v163_v23 = vpop.trf.xlu0 }
  0xcb   : > { %1091 = vmatprep.mubr.msk.bf16.mxu0 %vm261_vm1, %v239_v22  ;;  %v211_v25 = vmul.f32 0.35355338, %v163_v23 }
  0xce   : > { %v164_v24 = vpop.trf.xlu0 }
  0xcf   : > { %v212_v26 = vmul.f32 0.35355338, %v164_v24 }
  0xd1   : > { %v240_v27 = vpack.c.bf16 %v212_v26, %v211_v25  ;;  %v511_v26 = vlaneseq }
  0xd2   : > { %v165_v28 = vpop.trf.xlu0 }
  0xd3   : > { %1092 = vmatmul.mubr.msk.bf16.gmra.mxu0 %vm261_vm1, %v240_v27  ;;  %v213_v30 = vmul.f32 0.35355338, %v165_v28  ;;  %v1584_v28 = vand.u32 127, %v511_v26 }
  0xd5   : > { %vm513_vm2 = vcmp.lt.s32.totalorder %v1584_v28, 16 }
  0xd6   : > { %v166_v29 = vpop.trf.xlu0 }
  0xd7   : > { %v214_v31 = vmul.f32 0.35355338, %v166_v29 }
  0xd9   : > { %v241_v32 = vpack.c.bf16 %v214_v31, %v213_v30 }
  0xda   : > { %v167_v33 = vpop.trf.xlu0 }
  0xdb   : > { %1095 = vmatprep.mubr.msk.bf16.mxu0 %vm261_vm1, %v241_v32  ;;  %v215_v35 = vmul.f32 0.35355338, %v167_v33 }
  0xde   : > { %v168_v34 = vpop.trf.xlu0 }
  0xdf   : > { %v216_v36 = vmul.f32 0.35355338, %v168_v34 }
  0xe1   : > { %v242_v37 = vpack.c.bf16 %v216_v36, %v215_v35 }
  0xe2   : > { %v169_v38 = vpop.trf.xlu0 }
  0xe3   : > { %1096 = vmatmul.mubr.msk.bf16.gmra.mxu0 %vm261_vm1, %v242_v37  ;;  %v217_v40 = vmul.f32 0.35355338, %v169_v38 }
  0xe6   : > { %v170_v39 = vpop.trf.xlu0 }
  0xe7   : > { %v218_v41 = vmul.f32 0.35355338, %v170_v39 }
  0xe9   : > { %v243_v42 = vpack.c.bf16 %v218_v41, %v217_v40 }
  0xea   : > { %v171_v43 = vpop.trf.xlu0 }
  0xeb   : > { %1099 = vmatprep.mubr.msk.bf16.mxu0 %vm261_vm1, %v243_v42  ;;  %v219_v45 = vmul.f32 0.35355338, %v171_v43 }
  0xee   : > { %v172_v44 = vpop.trf.xlu0 }
  0xef   : > { %v220_v46 = vmul.f32 0.35355338, %v172_v44 }
  0xf1   : > { %v244_v47 = vpack.c.bf16 %v220_v46, %v219_v45 }
  0xf2   : > { %v189_v48 = vpop.trf.xlu0 }
  0xf3   : > { %1100 = vmatmul.mubr.msk.bf16.gmra.mxu0 %vm261_vm1, %v244_v47  ;;  %v221_v50 = vmul.f32 0.35355338, %v189_v48 }
  0xf6   : > { %v190_v49 = vpop.trf.xlu0 }
  0xf7   : > { %v222_v51 = vmul.f32 0.35355338, %v190_v49 }
  0xf9   : > { %v245_v52 = vpack.c.bf16 %v222_v51, %v221_v50 }
  0xfa   : > { %v191_v53 = vpop.trf.xlu0 }
  0xfb   : > { %1105 = vmatprep.mubr.msk.bf16.mxu1 %vm261_vm1, %v245_v52  ;;  %v223_v55 = vmul.f32 0.35355338, %v191_v53 }
  0xfe   : > { %v192_v54 = vpop.trf.xlu0 }
  0xff   : > { %v224_v56 = vmul.f32 0.35355338, %v192_v54 }
 0x101   : > { %v246_v57 = vpack.c.bf16 %v224_v56, %v223_v55 }
 0x102   : > { %v193_v58 = vpop.trf.xlu0 }
 0x103   : > { %1106 = vmatmul.mubr.msk.bf16.vlgmr.msra.gmra.mxu1 %vm261_vm1, %v246_v57  ;;  %v225_v60 = vmul.f32 0.35355338, %v193_v58 }
 0x106   : > { %v194_v59 = vpop.trf.xlu0 }
 0x107   : > { %v226_v61 = vmul.f32 0.35355338, %v194_v59 }
 0x109   : > { %v247_v62 = vpack.c.bf16 %v226_v61, %v225_v60 }
 0x10a   : > { %v195_v63 = vpop.trf.xlu0 }
 0x10b   : > { %1109 = vmatprep.mubr.msk.bf16.mxu1 %vm261_vm1, %v247_v62  ;;  %v227_v1 = vmul.f32 0.35355338, %v195_v63 }
 0x10e   : > { %v196_v0 = vpop.trf.xlu0 }
 0x10f   : > { %v228_v2 = vmul.f32 0.35355338, %v196_v0 }
 0x111   : > { %v248_v3 = vpack.c.bf16 %v228_v2, %v227_v1 }
 0x112   : > { %v197_v4 = vpop.trf.xlu0 }
 0x113   : > { %1110 = vmatmul.mubr.msk.bf16.gmra.mxu1 %vm261_vm1, %v248_v3  ;;  %v229_v6 = vmul.f32 0.35355338, %v197_v4 }
 0x116   : > { %v198_v5 = vpop.trf.xlu0 }
 0x117   : > { %v230_v7 = vmul.f32 0.35355338, %v198_v5 }
 0x119   : > { %v249_v8 = vpack.c.bf16 %v230_v7, %v229_v6 }
 0x11a   : > { %v199_v9 = vpop.trf.xlu0 }
 0x11b   : > { %1113 = vmatprep.mubr.msk.bf16.mxu1 %vm261_vm1, %v249_v8  ;;  %v231_v11 = vmul.f32 0.35355338, %v199_v9 }
 0x11e   : > { %v200_v10 = vpop.trf.xlu0 }
 0x11f   : > { %v232_v12 = vmul.f32 0.35355338, %v200_v10 }
 0x121   : > { %v250_v13 = vpack.c.bf16 %v232_v12, %v231_v11 }
 0x122   : > { %v201_v14 = vpop.trf.xlu0 }
 0x123   : > { %1114 = vmatmul.mubr.msk.bf16.gmra.mxu1 %vm261_vm1, %v250_v13  ;;  %v233_v15 = vmul.f32 0.35355338, %v201_v14 }
 0x126   : > { %v202_v16 = vpop.trf.xlu0 }
 0x127   : > { %v234_v17 = vmul.f32 0.35355338, %v202_v16 }
 0x129   : > { %v251_v18 = vpack.c.bf16 %v234_v17, %v233_v15 }
 0x12a   : > { %v203_v19 = vpop.trf.xlu0 }
 0x12b   : > { %1117 = vmatprep.mubr.msk.bf16.mxu1 %vm261_vm1, %v251_v18  ;;  %v235_v20 = vmul.f32 0.35355338, %v203_v19 }
 0x12e   : > { %v204_v21 = vpop.trf.xlu0 }
 0x12f   : > { %v236_v22 = vmul.f32 0.35355338, %v204_v21 }
 0x131   : > { %v252_v23 = vpack.c.bf16 %v236_v22, %v235_v20 }
 0x133   : > { %1118 = vmatmul.mubr.msk.bf16.gmra.mxu1 %vm261_vm1, %v252_v23 }
 0x183   : > { %v1578_v24 = vpop.f32.mrf.mxu0 }
 0x184   : > { %v1723_v18 = vsel %vm513_vm2, %v1578_v24, -1e+30 }
 0x185   : > { %v1580_v25 = vpop.f32.mrf.mxu0 }
 0x186   : > { %v1747_v22 = vsel %vm513_vm2, %v1580_v25, -1e+30 }
 0x187   : > { %v1582_v27 = vpop.f32.mrf.mxu0 }
 0x188   : > { %v1729_v19 = vsel %vm513_vm2, %v1582_v27, -1e+30 }
 0x189   : > { %v1586_v29 = vpop.f32.mrf.mxu0 }
 0x18a   : > { %v1753_v23 = vsel %vm513_vm2, %v1586_v29, -1e+30 }
 0x193   : > { %v1093_v30 = vpop.f32.mrf.mxu0 }
 0x194   : > { %v1591_v31 = vsel %vm513_vm2, %v1093_v30, -1e+30 }
 0x195   : > { %558 = vmax.xlane.f32.xlu1 %v1591_v31  ;;  %v1594_v32 = vpop.f32.mrf.mxu0 }
 0x196   : > { %v1702_v14 = vsel %vm513_vm2, %v1594_v32, -1e+30 }
 0x197   : > { %v1094_v33 = vpop.f32.mrf.mxu0 }
 0x198   : > { %v1598_v34 = vsel %vm513_vm2, %v1094_v33, -1e+30 }
 0x199   : > { %560 = vmax.xlane.f32.xlu0 %v1598_v34  ;;  %v343_v42 = vpop.f32.mrf.mxu0 }
 0x19a   : > { %v1707_v15 = vsel %vm513_vm2, %v343_v42, -1e+30 }
 0x1a3   : > { %v1097_v45 = vpop.f32.mrf.mxu0 }
 0x1a4   : > { %v1621_v46 = vsel %vm513_vm2, %v1097_v45, -1e+30 }
 0x1a5   : > { %v356_v50 = vpop.f32.mrf.mxu0 }
 0x1a6   : > { %v1631_v51 = vsel %vm513_vm2, %v356_v50, -1e+30 }
 0x1a7   : > { %v1098_v54 = vpop.f32.mrf.mxu0 }
 0x1a8   : > { %v1641_v55 = vsel %vm513_vm2, %v1098_v54, -1e+30 }
 0x1a9   : > { %v359_v58 = vpop.f32.mrf.mxu0 }
 0x1aa   : > { %v1651_v59 = vsel %vm513_vm2, %v359_v58, -1e+30 }
 0x1b3   : > { %v1101_v62 = vpop.f32.mrf.mxu0 }
 0x1b4   : > { %v1661_v63 = vsel %vm513_vm2, %v1101_v62, -1e+30 }
 0x1b5   : > { %v372_v2 = vpop.f32.mrf.mxu0 }
 0x1b6   : > { %v1671_v3 = vsel %vm513_vm2, %v372_v2, -1e+30 }
 0x1b7   : > { %v1102_v6 = vpop.f32.mrf.mxu0 }
 0x1b8   : > { %v1681_v7 = vsel %vm513_vm2, %v1102_v6, -1e+30 }
 0x1b9   : > { %v375_v10 = vpop.f32.mrf.mxu0 }
 0x1ba   : > { %v1691_v11 = vsel %vm513_vm2, %v375_v10, -1e+30 }
 0x1c3   : > { %v1601_v35 = vpop.f32.mrf.mxu1 }
 0x1c4   : > { %v1735_v20 = vsel %vm513_vm2, %v1601_v35, -1e+30 }
 0x1c5   : > { %v1603_v36 = vpop.f32.mrf.mxu1 }
 0x1c6   : > { %v1759_v24 = vsel %vm513_vm2, %v1603_v36, -1e+30 }
 0x1c7   : > { %v1605_v37 = vpop.f32.mrf.mxu1 }
 0x1c8   : > { %v1741_v21 = vsel %vm513_vm2, %v1605_v37, -1e+30 }
 0x1c9   : > { %v1607_v38 = vpop.f32.mrf.mxu1 }
 0x1ca   : > { %v1765_v25 = vsel %vm513_vm2, %v1607_v38, -1e+30 }
 0x1d3   : > { %v1111_v39 = vpop.f32.mrf.mxu1 }
 0x1d4   : > { %v1611_v40 = vsel %vm513_vm2, %v1111_v39, -1e+30 }
 0x1d5   : > { %590 = vmax.xlane.f32.xlu1 %v1611_v40  ;;  %v464_v41 = vpop.f32.mrf.mxu1 }
 0x1d6   : > { %v1712_v16 = vsel %vm513_vm2, %v464_v41, -1e+30 }
 0x1d7   : > { %v1112_v43 = vpop.f32.mrf.mxu1 }
 0x1d8   : > { %v1616_v44 = vsel %vm513_vm2, %v1112_v43, -1e+30 }
 0x1d9   : > { %592 = vmax.xlane.f32.xlu1 %v1616_v44  ;;  %v467_v47 = vpop.f32.mrf.mxu1 }
 0x1da   : > { %v1717_v17 = vsel %vm513_vm2, %v467_v47, -1e+30 }
 0x1dd   : > { %566 = vmax.xlane.f32.xlu1 %v1621_v46 }
 0x1e3   : > { %v1115_v48 = vpop.f32.mrf.mxu1 }
 0x1e4   : > { %v1626_v49 = vsel %vm513_vm2, %v1115_v48, -1e+30 }
 0x1e5   : > { %598 = vmax.xlane.f32.xlu1 %v1626_v49  ;;  %v480_v52 = vpop.f32.mrf.mxu1 }
 0x1e6   : > { %v1636_v53 = vsel %vm513_vm2, %v480_v52, -1e+30 }
 0x1e7   : > { %v1116_v56 = vpop.f32.mrf.mxu1 }
 0x1e8   : > { %v1646_v57 = vsel %vm513_vm2, %v1116_v56, -1e+30 }
 0x1e9   : > { %562 = vmax.xlane.f32.xlu1 %v1631_v51  ;;  %v483_v60 = vpop.f32.mrf.mxu1 }
 0x1ea   : > { %v1656_v61 = vsel %vm513_vm2, %v483_v60, -1e+30 }
 0x1ed   : > { %594 = vmax.xlane.f32.xlu1 %v1636_v53 }
 0x1f1   : > { %568 = vmax.xlane.f32.xlu1 %v1641_v55 }
 0x1f3   : > { %v1119_v0 = vpop.f32.mrf.mxu1 }
 0x1f4   : > { %v1666_v1 = vsel %vm513_vm2, %v1119_v0, -1e+30 }
 0x1f5   : > { %600 = vmax.xlane.f32.xlu1 %v1646_v57  ;;  %v496_v4 = vpop.f32.mrf.mxu1 }
 0x1f6   : > { %v1676_v5 = vsel %vm513_vm2, %v496_v4, -1e+30 }
 0x1f7   : > { %v1120_v8 = vpop.f32.mrf.mxu1 }
 0x1f8   : > { %v1686_v9 = vsel %vm513_vm2, %v1120_v8, -1e+30 }
 0x1f9   : > { %564 = vmax.xlane.f32.xlu1 %v1651_v59  ;;  %v499_v12 = vpop.f32.mrf.mxu1 }
 0x1fa   : > { %v1696_v13 = vsel %vm513_vm2, %v499_v12, -1e+30 }
 0x1fd   : > { %596 = vmax.xlane.f32.xlu1 %v1656_v61 }
 0x201   : > { %574 = vmax.xlane.f32.xlu1 %v1661_v63 }
 0x205   : > { %606 = vmax.xlane.f32.xlu1 %v1666_v1 }
 0x209   : > { %570 = vmax.xlane.f32.xlu1 %v1671_v3 }
 0x20d   : > { %602 = vmax.xlane.f32.xlu1 %v1676_v5 }
 0x211   : > { %576 = vmax.xlane.f32.xlu1 %v1681_v7 }
 0x215   : > { %608 = vmax.xlane.f32.xlu1 %v1686_v9 }
 0x219   : > { %572 = vmax.xlane.f32.xlu1 %v1691_v11 }
 0x21d   : > { %604 = vmax.xlane.f32.xlu1 %v1696_v13 }
 0x21e   : > { %v559_v26 = vpop.xlane.xlu1 %558 }
 0x21f   : > { %v616_v28 = vsub.f32 %v1591_v31, %v559_v26 }
 0x221   : > { %554 = vmax.xlane.f32.xlu1 %v1702_v14  ;;  %v654_v45 = vmul.f32 1.442695, %v616_v28 }
 0x225   : > { %556 = vmax.xlane.f32.xlu1 %v1707_v15 }
 0x229   : > { %586 = vmax.xlane.f32.xlu1 %v1712_v16 }
 0x22d   : > { %588 = vmax.xlane.f32.xlu1 %v1717_v17 }
 0x231   : > { %550 = vmax.xlane.f32.xlu1 %v1723_v18 }
 0x235   : > { %552 = vmax.xlane.f32.xlu1 %v1729_v19 }
 0x239   : > { %582 = vmax.xlane.f32.xlu1 %v1735_v20 }
 0x23d   : > { %584 = vmax.xlane.f32.xlu1 %v1741_v21 }
 0x241   : > { %546 = vmax.xlane.f32.xlu1 %v1747_v22 }
 0x245   : > { %548 = vmax.xlane.f32.xlu1 %v1753_v23 }
 0x249   : > { %578 = vmax.xlane.f32.xlu1 %v1759_v24 }
 0x24d   : > { %580 = vmax.xlane.f32.xlu1 %v1765_v25 }
 0x25e   : > { %v591_v27 = vpop.xlane.xlu1 %590 }
 0x25f   : > { %v632_v47 = vsub.f32 %v1611_v40, %v591_v27 }
 0x261   : > { %v686_v31 = vmul.f32 1.442695, %v632_v47 }
 0x262   : > { %v1768_v29 = vpop.xlane.xlu1 %592 }
 0x266   : > { %v567_v30 = vpop.xlane.xlu1 %566 }
 0x267   : > { %v620_v32 = vsub.f32 %v1621_v46, %v567_v30 }
 0x269   : > { %v662_v33 = vmul.f32 1.442695, %v620_v32 }
 0x26b   : > { %1218 = vpow2.f32 %v662_v33 }
 0x26e   : > { %v1771_v35 = vpop.xlane.xlu1 %598 }
 0x272   : > { %v563_v36 = vpop.xlane.xlu1 %562 }
 0x273   : > { %v618_v37 = vsub.f32 %v1631_v51, %v563_v36 }
 0x275   : > { %v658_v39 = vmul.f32 1.442695, %v618_v37 }
 0x276   : > { %v595_v38 = vpop.xlane.xlu1 %594 }
 0x277   : > { %1220 = vpow2.f32 %v658_v39  ;;  %v634_v41 = vsub.f32 %v1636_v53, %v595_v38 }
 0x278   : > { %v1776_v42 = vpop.eup %1218 }
 0x279   : > { %v690_v43 = vmul.f32 1.442695, %v634_v41  ;;  %726 = vadd.xlane.f32.xlu1 %v1776_v42  ;;  %v636_v41 = vsub.f32 %v1626_v49, %v1771_v35 }
 0x27a   : > { %v569_v46 = vpop.xlane.xlu1 %568 }
 0x27b   : > { %1222 = vpow2.f32 %v690_v43  ;;  %v621_v48 = vsub.f32 %v1641_v55, %v569_v46  ;;  %v694_v47 = vmul.f32 1.442695, %v636_v41 }
 0x27c   : > { %1224 = vpow2.f32 %v654_v45 }
 0x27d   : > { %v664_v50 = vmul.f32 1.442695, %v621_v48 }
 0x27e   : > { %v1781_v51 = vpop.xlane.xlu1 %600 }
 0x27f   : > { %1226 = vpow2.f32 %v664_v50 }
 0x280   : > { %1228 = vpow2.f32 %v686_v31 }
 0x282   : > { %v1783_v52 = vpop.xlane.xlu1 %564 }
 0x284   : > { %v1785_v53 = vpop.eup %1220 }
 0x285   : > { %722 = vadd.xlane.f32.xlu0 %v1785_v53 }
 0x286   : > { %v1788_v54 = vpop.xlane.xlu1 %596 }
 0x288   : > { %v1790_v56 = vpop.eup %1222 }
 0x289   : > { %754 = vadd.xlane.f32.xlu0 %v1790_v56  ;;  %v1793_v55 = vpop.eup %1224 }
 0x28a   : > { %v575_v40 = vpop.xlane.xlu1 %574 }
 0x28b   : > { %v624_v58 = vsub.f32 %v1661_v63, %v575_v40 }
 0x28c   : > { %v1796_v60 = vpop.eup %1226 }
 0x28d   : > { %v670_v62 = vmul.f32 1.442695, %v624_v58  ;;  %718 = vadd.xlane.f32.xlu0 %v1793_v55  ;;  %728 = vadd.xlane.f32.xlu1 %v1796_v60  ;;  %v1801_v4 = vpop.eup %1228 }
 0x28e   : > { %v607_v0 = vpop.xlane.xlu1 %606 }
 0x28f   : > { %1230 = vpow2.f32 %v670_v62  ;;  %v640_v2 = vsub.f32 %v1666_v1, %v607_v0  ;;  %v561_v62 = vpop.xlane.xlu0 %560 }
 0x291   : > { %v702_v6 = vmul.f32 1.442695, %v640_v2  ;;  %750 = vadd.xlane.f32.xlu0 %v1801_v4 }
 0x292   : > { %v571_v8 = vpop.xlane.xlu1 %570 }
 0x293   : > { %1232 = vpow2.f32 %v702_v6  ;;  %v622_v63 = vsub.f32 %v1671_v3, %v571_v8 }
 0x295   : > { %v666_v10 = vmul.f32 1.442695, %v622_v63 }
 0x296   : > { %v603_v12 = vpop.xlane.xlu1 %602 }
 0x297   : > { %1234 = vpow2.f32 %v666_v10  ;;  %v638_v26 = vsub.f32 %v1676_v5, %v603_v12 }
 0x299   : > { %v698_v27 = vmul.f32 1.442695, %v638_v26 }
 0x29a   : > { %v577_v30 = vpop.xlane.xlu1 %576 }
 0x29b   : > { %1236 = vpow2.f32 %v698_v27  ;;  %v625_v32 = vsub.f32 %v1681_v7, %v577_v30 }
 0x29c   : > { %v1807_v1 = vpop.eup %1230 }
 0x29d   : > { %v672_v33 = vmul.f32 1.442695, %v625_v32  ;;  %734 = vadd.xlane.f32.xlu1 %v1807_v1 }
 0x29e   : > { %v609_v36 = vpop.xlane.xlu1 %608 }
 0x29f   : > { %1238 = vpow2.f32 %v672_v33  ;;  %v641_v37 = vsub.f32 %v1686_v9, %v609_v36 }
 0x2a0   : > { %v1811_v3 = vpop.eup %1232 }
 0x2a1   : > { %v704_v39 = vmul.f32 1.442695, %v641_v37  ;;  %766 = vadd.xlane.f32.xlu1 %v1811_v3 }
 0x2a2   : > { %v573_v5 = vpop.xlane.xlu1 %572 }
 0x2a3   : > { %1240 = vpow2.f32 %v704_v39  ;;  %v623_v28 = vsub.f32 %v1691_v11, %v573_v5  ;;  %v637_v11 = vsub.f32 %v1646_v57, %v1781_v51 }
 0x2a4   : > { %v1815_v38 = vpop.eup %1234 }
 0x2a5   : > { %v668_v7 = vmul.f32 1.442695, %v623_v28  ;;  %730 = vadd.xlane.f32.xlu1 %v1815_v38  ;;  %v696_v40 = vmul.f32 1.442695, %v637_v11 }
 0x2a6   : > { %v605_v43 = vpop.xlane.xlu1 %604 }
 0x2a7   : > { %1242 = vpow2.f32 %v668_v7  ;;  %v639_v9 = vsub.f32 %v1696_v13, %v605_v43  ;;  %v619_v13 = vsub.f32 %v1651_v59, %v1783_v52  ;;  %v617_v59 = vsub.f32 %v1598_v34, %v561_v62 }
 0x2a8   : > { %v1821_v45 = vpop.eup %1236 }
 0x2a9   : > { %v700_v46 = vmul.f32 1.442695, %v639_v9  ;;  %762 = vadd.xlane.f32.xlu1 %v1821_v45  ;;  %v660_v57 = vmul.f32 1.442695, %v619_v13  ;;  %v656_v10 = vmul.f32 1.442695, %v617_v59 }
 0x2aa   : > { %v555_v48 = vpop.xlane.xlu1 %554 }
 0x2ab   : > { %1244 = vpow2.f32 %v700_v46  ;;  %v614_v50 = vsub.f32 %v1702_v14, %v555_v48  ;;  %v635_v14 = vsub.f32 %v1656_v61, %v1788_v54 }
 0x2ac   : > { %v1827_v31 = vpop.eup %1238  ;;  %1246 = vpow2.f32 %v694_v47 }
 0x2ad   : > { %v650_v49 = vmul.f32 1.442695, %v614_v50  ;;  %736 = vadd.xlane.f32.xlu1 %v1827_v31  ;;  %v692_v8 = vmul.f32 1.442695, %v635_v14 }
 0x2ae   : > { %v557_v35 = vpop.xlane.xlu1 %556 }
 0x2af   : > { %1248 = vpow2.f32 %v650_v49  ;;  %v615_v27 = vsub.f32 %v1707_v15, %v557_v35 }
 0x2b0   : > { %v1832_v58 = vpop.eup %1240  ;;  %1250 = vpow2.f32 %v696_v40 }
 0x2b1   : > { %768 = vadd.xlane.f32.xlu1 %v1832_v58  ;;  %1252 = vpow2.f32 %v660_v57 }
 0x2b2   : > { %v587_v51 = vpop.xlane.xlu1 %586 }
 0x2b3   : > { %v630_v0 = vsub.f32 %v1712_v16, %v587_v51  ;;  %v633_v16 = vsub.f32 %v1616_v44, %v1768_v29  ;;  %v652_v44 = vmul.f32 1.442695, %v615_v27 }
 0x2b4   : > { %v1838_v2 = vpop.eup %1242 }
 0x2b5   : > { %v682_v6 = vmul.f32 1.442695, %v630_v0  ;;  %732 = vadd.xlane.f32.xlu1 %v1838_v2  ;;  %v688_v32 = vmul.f32 1.442695, %v633_v16 }
 0x2b6   : > { %v589_v52 = vpop.xlane.xlu1 %588 }
 0x2b7   : > { %1254 = vpow2.f32 %v682_v6  ;;  %v631_v36 = vsub.f32 %v1717_v17, %v589_v52  ;;  %v1443_v17 = vmov 0.0  }
 0x2b8   : > { %v1842_v63 = vpop.eup %1244  ;;  %1256 = vpow2.f32 %v692_v8  ;;  %1121 = vmatprep.subr.bf16.mxu0 %v1443_v17  ;;  %1141 = vmatprep.subr.bf16.mxu1 %v1443_v17 }
 0x2b9   : > { %764 = vadd.xlane.f32.xlu1 %v1842_v63  ;;  %v1845_v61 = vpop.eup %1246  ;;  %1258 = vpow2.f32 %v656_v10  ;;  %v684_v7 = vmul.f32 1.442695, %v631_v36  ;;  %1137 = vmatprep.mubr.msk.bf16.mxu0 %vm1444_vm3, %v1443_v17 }
 0x2ba   : > { %v551_v12 = vpop.xlane.xlu1 %550  ;;  %1157 = vmatprep.mubr.msk.bf16.mxu1 %vm1444_vm3, %v1443_v17 }
 0x2bb   : > { %v612_v54 = vsub.f32 %v1723_v18, %v551_v12 }
 0x2bc   : > { %v1850_v26 = vpop.eup %1248 }
 0x2bd   : > { %v646_v34 = vmul.f32 1.442695, %v612_v54  ;;  %758 = vadd.xlane.f32.xlu1 %v1845_v61  ;;  %714 = vadd.xlane.f32.xlu0 %v1850_v26  ;;  %v1855_v33 = vpop.eup %1250 }
 0x2be   : > { %v553_v30 = vpop.xlane.xlu1 %552  ;;  %v1858_v18 = vpop.eup %1252 }
 0x2bf   : > { %1260 = vpow2.f32 %v646_v34  ;;  %v613_v15 = vsub.f32 %v1729_v19, %v553_v30 }
 0x2c0   : > { %1262 = vpow2.f32 %v688_v32 }
 0x2c1   : > { %760 = vadd.xlane.f32.xlu1 %v1855_v33  ;;  %1264 = vpow2.f32 %v652_v44 }
 0x2c2   : > { %v583_v29 = vpop.xlane.xlu1 %582 }
 0x2c3   : > { %v628_v37 = vsub.f32 %v1735_v20, %v583_v29  ;;  %v648_v20 = vmul.f32 1.442695, %v613_v15 }
 0x2c4   : > { %v1862_v39 = vpop.eup %1254 }
 0x2c5   : > { %v678_v5 = vmul.f32 1.442695, %v628_v37  ;;  %724 = vadd.xlane.f32.xlu1 %v1858_v18  ;;  %746 = vadd.xlane.f32.xlu0 %v1862_v39  ;;  %v1867_v41 = vpop.eup %1256 }
 0x2c6   : > { %v585_v28 = vpop.xlane.xlu1 %584  ;;  %v1872_v9 = vpop.eup %1258 }
 0x2c7   : > { %1266 = vpow2.f32 %v678_v5  ;;  %v629_v46 = vsub.f32 %v1741_v21, %v585_v28 }
 0x2c8   : > { %1268 = vpow2.f32 %v684_v7 }
 0x2c9   : > { %756 = vadd.xlane.f32.xlu1 %v1867_v41  ;;  %1270 = vpow2.f32 %v648_v20  ;;  %v680_v50 = vmul.f32 1.442695, %v629_v46 }
 0x2ca   : > { %v547_v43 = vpop.xlane.xlu1 %546 }
 0x2cb   : > { %v610_v19 = vsub.f32 %v1747_v22, %v547_v43 }
 0x2cc   : > { %v1876_v47 = vpop.eup %1260 }
 0x2cd   : > { %v642_v48 = vmul.f32 1.442695, %v610_v19  ;;  %710 = vadd.xlane.f32.xlu0 %v1876_v47  ;;  %720 = vadd.xlane.f32.xlu1 %v1872_v9  ;;  %v1881_v13 = vpop.eup %1262 }
 0x2ce   : > { %v549_v11 = vpop.xlane.xlu1 %548  ;;  %v1884_v22 = vpop.eup %1264 }
 0x2cf   : > { %1272 = vpow2.f32 %v642_v48  ;;  %v611_v49 = vsub.f32 %v1753_v23, %v549_v11 }
 0x2d0   : > { %1274 = vpow2.f32 %v680_v50 }
 0x2d1   : > { %752 = vadd.xlane.f32.xlu1 %v1881_v13  ;;  %v644_v21 = vmul.f32 1.442695, %v611_v49 }
 0x2d2   : > { %v579_v35 = vpop.xlane.xlu1 %578 }
 0x2d3   : > { %v626_v40 = vsub.f32 %v1759_v24, %v579_v35  ;;  %1276 = vpow2.f32 %v644_v21 }
 0x2d4   : > { %v1887_v57 = vpop.eup %1266 }
 0x2d5   : > { %v674_v51 = vmul.f32 1.442695, %v626_v40  ;;  %742 = vadd.xlane.f32.xlu0 %v1887_v57  ;;  %716 = vadd.xlane.f32.xlu1 %v1884_v22  ;;  %v1892_v14 = vpop.eup %1268 }
 0x2d6   : > { %v581_v23 = vpop.xlane.xlu1 %580  ;;  %v1895_v6 = vpop.eup %1270 }
 0x2d7   : > { %1278 = vpow2.f32 %v674_v51  ;;  %v627_v62 = vsub.f32 %v1765_v25, %v581_v23 }
 0x2d9   : > { %v676_v0 = vmul.f32 1.442695, %v627_v62  ;;  %748 = vadd.xlane.f32.xlu1 %v1892_v14 }
 0x2db   : > { %1280 = vpow2.f32 %v676_v0 }
 0x2dc   : > { %v1897_v24 = vpop.eup %1272 }
 0x2dd   : > { %706 = vadd.xlane.f32.xlu0 %v1897_v24  ;;  %712 = vadd.xlane.f32.xlu1 %v1895_v6  ;;  %v1901_v59 = vpop.eup %1274 }
 0x2e0   : > { %v1904_v52 = vpop.eup %1276 }
 0x2e1   : > { %744 = vadd.xlane.f32.xlu1 %v1901_v59 }
 0x2e4   : > { %v1906_v25 = vpop.eup %1278 }
 0x2e5   : > { %738 = vadd.xlane.f32.xlu0 %v1906_v25  ;;  %708 = vadd.xlane.f32.xlu1 %v1904_v52 }
 0x2e8   : > { %v1910_v8 = vpop.eup %1280 }
 0x2e9   : > { %740 = vadd.xlane.f32.xlu1 %v1910_v8 }
 0x302   : > { %v727_v10 = vpop.xlane.xlu1 %726 }
 0x30e   : > { %v723_v5 = vpop.xlane.xlu0 %722 }
 0x312   : > { %v755_v50 = vpop.xlane.xlu0 %754 }
 0x316   : > { %v729_v12 = vpop.xlane.xlu1 %728  ;;  %v719_v62 = vpop.xlane.xlu0 %718 }
 0x326   : > { %v735_v16 = vpop.xlane.xlu1 %734 }
 0x327   : > { %1282 = vrcp.f32 %v735_v16 }
 0x32a   : > { %v767_v54 = vpop.xlane.xlu1 %766 }
 0x32e   : > { %v731_v34 = vpop.xlane.xlu1 %730 }
 0x332   : > { %v763_v27 = vpop.xlane.xlu1 %762 }
 0x334   : > { %v1283_v29 = vpop.eup %1282 }
 0x335   : > { %v816_v15 = vmul.f32 %v1283_v29, %v1807_v1 }
 0x336   : > { %v737_v30 = vpop.xlane.xlu1 %736 }
 0x337   : > { %1284 = vrcp.f32 %v737_v30 }
 0x338   : > { %1286 = vrcp.f32 %v767_v54 }
 0x33a   : > { %v769_v32 = vpop.xlane.xlu1 %768 }
 0x33b   : > { %1288 = vrcp.f32 %v769_v32 }
 0x33c   : > { %1290 = vrcp.f32 %v731_v34 }
 0x33e   : > { %v733_v44 = vpop.xlane.xlu1 %732 }
 0x33f   : > { %1292 = vrcp.f32 %v733_v44 }
 0x340   : > { %1294 = vrcp.f32 %v763_v27  ;;  %v751_v27 = vpop.xlane.xlu0 %750 }
 0x341   : > { %1296 = vrcp.f32 %v729_v12 }
 0x342   : > { %v765_v36 = vpop.xlane.xlu1 %764 }
 0x343   : > { %1298 = vrcp.f32 %v765_v36 }
 0x344   : > { %v1285_v37 = vpop.eup %1284  ;;  %1300 = vrcp.f32 %v727_v10 }
 0x345   : > { %v817_v28 = vmul.f32 %v1285_v37, %v1827_v31  ;;  %v1287_v7 = vpop.eup %1286 }
 0x346   : > { %v759_v20 = vpop.xlane.xlu1 %758  ;;  %v832_v19 = vmul.f32 %v1287_v7, %v1811_v3 }
 0x347   : > { %v841_v43 = vpack.c.bf16 %v817_v28, %v816_v15  ;;  %1302 = vrcp.f32 %v759_v20 }
 0x348   : > { %v1289_v46 = vpop.eup %1288 }
 0x349   : > { %1122 = vmatpush3.bf16.xpose.msra.mxu0 %v841_v43  ;;  %v833_v48 = vmul.f32 %v1289_v46, %v1832_v58  ;;  %v1291_v11 = vpop.eup %1290 }
 0x34a   : > { %v761_v49 = vpop.xlane.xlu1 %760  ;;  %1123 = vmatprep.subr.bf16.mxu0 %v1443_v17  ;;  %v814_v31 = vmul.f32 %v1291_v11, %v1815_v38 }
 0x34b   : > { %1304 = vrcp.f32 %v761_v49  ;;  %v849_v21 = vpack.c.bf16 %v833_v48, %v832_v19 }
 0x34c   : > { %v1293_v1 = vpop.eup %1292  ;;  %1306 = vrcp.f32 %v723_v5 }
 0x34d   : > { %1142 = vmatpush3.bf16.xpose.msra.mxu1 %v849_v21  ;;  %v815_v35 = vmul.f32 %v1293_v1, %v1838_v2  ;;  %v1295_v40 = vpop.eup %1294 }
 0x34e   : > { %v725_v51 = vpop.xlane.xlu1 %724  ;;  %1143 = vmatprep.subr.bf16.mxu1 %v1443_v17  ;;  %v1297_v3 = vpop.eup %1296  ;;  %v830_v0 = vmul.f32 %v1295_v40, %v1821_v45 }
 0x34f   : > { %1308 = vrcp.f32 %v725_v51  ;;  %v840_v58 = vpack.c.bf16 %v815_v35, %v814_v31  ;;  %v813_v2 = vmul.f32 %v1297_v3, %v1796_v60  ;;  %v715_v60 = vpop.xlane.xlu0 %714 }
 0x350   : > { %v1299_v23 = vpop.eup %1298  ;;  %1310 = vrcp.f32 %v755_v50 }
 0x351   : > { %1124 = vmatpush3.bf16.xpose.msra.mxu0 %v840_v58  ;;  %v831_v10 = vmul.f32 %v1299_v23, %v1842_v63  ;;  %v1301_v12 = vpop.eup %1300 }
 0x352   : > { %v757_v16 = vpop.xlane.xlu1 %756  ;;  %1125 = vmatprep.subr.bf16.mxu0 %v1443_v17  ;;  %v812_v54 = vmul.f32 %v1301_v12, %v1776_v42 }
 0x353   : > { %1312 = vrcp.f32 %v757_v16  ;;  %v848_v38 = vpack.c.bf16 %v831_v10, %v830_v0  ;;  %v747_v7 = vpop.xlane.xlu0 %746 }
 0x354   : > { %1314 = vrcp.f32 %v719_v62  ;;  %v1303_v34 = vpop.eup %1302  ;;  %v839_v45 = vpack.c.bf16 %v813_v2, %v812_v54 }
 0x355   : > { %1144 = vmatpush3.bf16.xpose.msra.mxu1 %v848_v38  ;;  %v828_v32 = vmul.f32 %v1303_v34, %v1845_v61 }
 0x356   : > { %v721_v30 = vpop.xlane.xlu1 %720  ;;  %1145 = vmatprep.subr.bf16.mxu1 %v1443_v17 }
 0x357   : > { %1316 = vrcp.f32 %v721_v30  ;;  %v711_v48 = vpop.xlane.xlu0 %710 }
 0x358   : > { %v1305_v63 = vpop.eup %1304  ;;  %1318 = vrcp.f32 %v751_v27 }
 0x359   : > { %1126 = vmatpush3.bf16.xpose.msra.mxu0 %v839_v45  ;;  %v829_v44 = vmul.f32 %v1305_v63, %v1855_v33  ;;  %v1307_v29 = vpop.eup %1306 }
 0x35a   : > { %v753_v36 = vpop.xlane.xlu1 %752  ;;  %1127 = vmatprep.subr.bf16.mxu0 %v1443_v17  ;;  %v810_v5 = vmul.f32 %v1307_v29, %v1785_v53 }
 0x35b   : > { %1320 = vrcp.f32 %v753_v36  ;;  %v847_v42 = vpack.c.bf16 %v829_v44, %v828_v32 }
 0x35c   : > { %v1309_v37 = vpop.eup %1308  ;;  %1322 = vrcp.f32 %v715_v60 }
 0x35d   : > { %1146 = vmatpush3.bf16.xpose.msra.mxu1 %v847_v42  ;;  %v811_v15 = vmul.f32 %v1309_v37, %v1858_v18  ;;  %v1311_v28 = vpop.eup %1310  ;;  %v257_v37 = vld [vmem:[%s1552_s29 + $0x10] sm:$0xff] }
 0x35e   : > { %v717_v20 = vpop.xlane.xlu1 %716  ;;  %1147 = vmatprep.subr.bf16.mxu1 %v1443_v17  ;;  %v826_v43 = vmul.f32 %v1311_v28, %v1790_v56  ;;  %v743_v1 = vpop.xlane.xlu0 %742  ;;  %v258_v28 = vld [vmem:[%s1552_s29 + $0x28] sm:$0xff] }
 0x35f   : > { %1324 = vrcp.f32 %v717_v20  ;;  %v838_v61 = vpack.c.bf16 %v811_v15, %v810_v5  ;;  %v259_v15 = vpack.c.bf16 %v257_v37, %v257_v37 }
 0x360   : > { %v1313_v33 = vpop.eup %1312  ;;  %1326 = vrcp.f32 %v747_v7 }
 0x361   : > { %1128 = vmatpush3.bf16.xpose.msra.mxu0 %v838_v61  ;;  %v827_v46 = vmul.f32 %v1313_v33, %v1867_v41  ;;  %v1315_v19 = vpop.eup %1314 }
 0x362   : > { %v749_v11 = vpop.xlane.xlu1 %748  ;;  %1129 = vmatprep.subr.bf16.mxu0 %v1443_v17  ;;  %v808_v50 = vmul.f32 %v1315_v19, %v1793_v55 }
 0x363   : > { %1328 = vrcp.f32 %v749_v11  ;;  %v846_v53 = vpack.c.bf16 %v827_v46, %v826_v43 }
 0x364   : > { %v1317_v18 = vpop.eup %1316  ;;  %1330 = vrcp.f32 %v711_v48 }
 0x365   : > { %1148 = vmatpush3.bf16.xpose.msra.mxu1 %v846_v53  ;;  %v809_v49 = vmul.f32 %v1317_v18, %v1872_v9  ;;  %v1319_v21 = vpop.eup %1318 }
 0x366   : > { %v713_v31 = vpop.xlane.xlu1 %712  ;;  %1149 = vmatprep.subr.bf16.mxu1 %v1443_v17  ;;  %v824_v35 = vmul.f32 %v1319_v21, %v1801_v4  ;;  %v707_v3 = vpop.xlane.xlu0 %706 }
 0x367   : > { %1332 = vrcp.f32 %v713_v31  ;;  %v837_v56 = vpack.c.bf16 %v809_v49, %v808_v50 }
 0x368   : > { %v1321_v41 = vpop.eup %1320  ;;  %1334 = vrcp.f32 %v743_v1 }
 0x369   : > { %1130 = vmatpush3.bf16.xpose.msra.mxu0 %v837_v56  ;;  %v825_v40 = vmul.f32 %v1321_v41, %v1881_v13  ;;  %v1323_v51 = vpop.eup %1322 }
 0x36a   : > { %v745_v58 = vpop.xlane.xlu1 %744  ;;  %1131 = vmatprep.subr.bf16.mxu0 %v1443_v17  ;;  %v806_v23 = vmul.f32 %v1323_v51, %v1850_v26 }
 0x36b   : > { %1336 = vrcp.f32 %v745_v58  ;;  %v845_v55 = vpack.c.bf16 %v825_v40, %v824_v35 }
 0x36c   : > { %v1325_v9 = vpop.eup %1324  ;;  %1338 = vrcp.f32 %v707_v3 }
 0x36d   : > { %1150 = vmatpush3.bf16.xpose.msra.mxu1 %v845_v55  ;;  %v807_v62 = vmul.f32 %v1325_v9, %v1884_v22  ;;  %v1327_v0 = vpop.eup %1326 }
 0x36e   : > { %v709_v10 = vpop.xlane.xlu1 %708  ;;  %v739_v12 = vpop.xlane.xlu0 %738  ;;  %1151 = vmatprep.subr.bf16.mxu1 %v1443_v17  ;;  %v822_v16 = vmul.f32 %v1327_v0, %v1862_v39 }
 0x36f   : > { %1340 = vrcp.f32 %v709_v10  ;;  %v836_v4 = vpack.c.bf16 %v807_v62, %v806_v23 }
 0x370   : > { %v1329_v13 = vpop.eup %1328  ;;  %1342 = vrcp.f32 %v739_v12 }
 0x371   : > { %1132 = vmatpush3.bf16.xpose.msra.mxu0 %v836_v4  ;;  %v823_v38 = vmul.f32 %v1329_v13, %v1892_v14  ;;  %v1331_v2 = vpop.eup %1330 }
 0x372   : > { %v741_v54 = vpop.xlane.xlu1 %740  ;;  %1133 = vmatprep.subr.bf16.mxu0 %v1443_v17  ;;  %v804_v34 = vmul.f32 %v1331_v2, %v1876_v47 }
 0x373   : > { %1344 = vrcp.f32 %v741_v54  ;;  %v844_v26 = vpack.c.bf16 %v823_v38, %v822_v16 }
 0x374   : > { %v1333_v22 = vpop.eup %1332 }
 0x375   : > { %1152 = vmatpush3.bf16.xpose.msra.mxu1 %v844_v26  ;;  %v805_v27 = vmul.f32 %v1333_v22, %v1895_v6  ;;  %v1335_v30 = vpop.eup %1334 }
 0x376   : > { %1153 = vmatprep.subr.bf16.mxu1 %v1443_v17  ;;  %v820_v39 = vmul.f32 %v1335_v30, %v1887_v57 }
 0x377   : > { %v835_v45 = vpack.c.bf16 %v805_v27, %v804_v34 }
 0x378   : > { %v1337_v63 = vpop.eup %1336 }
 0x379   : > { %1134 = vmatpush3.bf16.xpose.msra.mxu0 %v835_v45  ;;  %v821_v14 = vmul.f32 %v1337_v63, %v1901_v59  ;;  %v1339_v32 = vpop.eup %1338 }
 0x37a   : > { %1135 = vmatprep.subr.bf16.mxu0 %v1443_v17  ;;  %v802_v47 = vmul.f32 %v1339_v32, %v1897_v24  ;;  %v260_v24 = vpack.c.bf16 %v258_v28, %v258_v28 }
 0x37b   : > { %v843_v44 = vpack.c.bf16 %v821_v14, %v820_v39 }
 0x37c   : > { %v1341_v29 = vpop.eup %1340 }
 0x37d   : > { %1154 = vmatpush3.bf16.xpose.msra.mxu1 %v843_v44  ;;  %v803_v6 = vmul.f32 %v1341_v29, %v1904_v52  ;;  %v1343_v60 = vpop.eup %1342 }
 0x37e   : > { %1155 = vmatprep.subr.bf16.mxu1 %v1443_v17  ;;  %v818_v59 = vmul.f32 %v1343_v60, %v1906_v25 }
 0x37f   : > { %v834_v36 = vpack.c.bf16 %v803_v6, %v802_v47 }
 0x380   : > { %v1345_v57 = vpop.eup %1344 }
 0x381   : > { %1136 = vmatpush3.bf16.xpose.msra.mxu0 %v834_v36  ;;  %v819_v42 = vmul.f32 %v1345_v57, %v1910_v8 }
 0x383   : > { %v842_v5 = vpack.c.bf16 %v819_v42, %v818_v59 }
 0x385   : > { %1156 = vmatpush3.bf16.xpose.msra.mxu1 %v842_v5 }
 0x388   : > { %1138 = vmatmul.mubr.bf16.vlgmr.msra.gmra.mxu0 %v259_v15 }
 0x38c   : > { %1158 = vmatmul.mubr.bf16.vlgmr.msra.gmra.mxu1 %v260_v24 }
 0x448   : > { %v884_v17 = vpop.f32.mrf.mxu0 }
 0x449   : > { %930 = vst [vmem:[%s135_s24] sm:$0xff] %v884_v17 }
 0x44a   : > { %v1139_v52 = vpop.f32.mrf.mxu0 }
 0x44c   : > { %v887_v25 = vpop.f32.mrf.mxu0  ;;  %v924_v8 = vpop.f32.mrf.mxu1 }
 0x44d   : > { %931 = vst [vmem:[%s135_s24 + $0x8] sm:$0xff] %v924_v8 }
 0x44e   : > { %v1140_v7 = vpop.f32.mrf.mxu0  ;;  %v1159_v20 = vpop.f32.mrf.mxu1 }
 0x44f   : > { %1387 = shalt.err (!%p1384_p9)
}
 0x450   : > { %s1388_s13 = scalar_lea.hbm %s1970_s2, 256  ;;  %s1392_s20 = scalar_lea.hbm %s2013_s1, 1024 }
 0x451   : > { %p1389_p13 = scmp.ne.s32.totalorder %s1970_s2, %s1388_s13  ;;  %p1393_p2 = scmp.lt.s32.totalorder %s1970_s2, %s2013_s1 }
 0x452   : > { %p1394_p3 = scmp.lt.s32.totalorder %s1392_s20, %s1388_s13 }
 0x453   : > { %p1390_p1 = pnand %p1389_p13, %p2021_p11 }
 0x454   : > { %p1395_p6 = por %p1394_p3, %p1393_p2 }
 0x455   : > { %p1391_p0 = pneg %p1390_p1 }
 0x457   : > { %p1396_p10 = pnand %p1395_p6, %p1391_p0 }
 0x459   : > { %1399 = shalt.err (!%p1396_p10)
}
 0x45a   : > { %s1446_s26 = smov 128   ;;  %s1447_s29 = smov 8   ;;  %v927_v61 = vpop.f32.mrf.mxu1 }
 0x45b   : > { %1168 = dma.vmem_to_hbm [thread:$0]  (%p2021_p11), %s1965_s25, 256, %s1970_s2, %s933_s3, %s1446_s26, %s1446_s26, %s1447_s29  }
 0x45c   : > { %v1160_v33 = vpop.f32.mrf.mxu1 }
 0x45d PF: > { %p1179_p12 = scmp.ge.s32.totalorder %s1438_s9, 2  ;;  %s961_s16 = sand.u32 1, %s1426_s6  }
 0x45e   : > { %p2022_p4 = scmp.ne.s32.totalorder %s2018_s18, 0  ;;  %s962_s24 = scalar_lea.sflag [#allocation4], %s961_s16 }
 0x460   : > { %p1175_p5 = pnand %p1179_p12, %p2022_p4 }
 0x462   : > { %p1176_p7 = pneg %p1175_p5 }
 0x464   : > { %1421 = dma.done.wait (%p1176_p7), %s962_s24, 256  }
 0x465   : > { %1423 = vsyncadd (%p1176_p7), %s962_s24, 4294967040  ;;  %p14_p11 = scmp.ge.s32.totalorder %s1483_s12, 6   ;;  %s2023_s6 = smov %s1430_s7 }
 0x466   : > { %s2024_s7 = smov %s1434_s8  ;;  %s2025_s8 = smov %s1495_s15 }
 0x467   : > { %s2026_s9 = smov %s1483_s12  ;;  %16 = sbr.rel (!%p14_p11) target bundleno = 5 (0x5), region = 69 }
 0x46c   :  { %967 = vsyncpa [#allocation3], 1 }
 0x46d   :  { %969 = vsyncpa [#allocation3 + $0x1], 1 }
 0x46e   :  { %970 = vsyncpa [#allocation4], 1 }
 0x46f   :  { %972 = vsyncpa [#allocation4 + $0x1], 1 }

</bundles_post_ra>
